<compile_context>
chip_gen: v5e
topology: v5e:2x2
jax: 0.10.0
libtpu: 0.0.40
codegen_flags: <defaults>
</compile_context>

<pallas_src>
import functools

import jax
import jax.numpy as jnp
from jax import lax
from jax.experimental import pallas as pl
from jax.experimental.pallas import tpu as pltpu


def _vmem_limit_bytes():
    """Generation-aware scoped-VMEM limit: ~75% of physical, capped at 96 MiB."""
    cap = 64 * 1024 * 1024                       # conservative default (v7x physical)
    try:
        info = pltpu.get_tpu_info()
        cap = int(getattr(info, "vmem_capacity_bytes", cap))
    except Exception:
        pass
    return min(cap * 3 // 4, 96 * 1024 * 1024)   # 48 MiB on v7x, 96 MiB on v5e/v6e


def _pick_hw_block(hw_pad, n_batch, *, in_bytes_per_lane, out_bytes_per_lane,
                   vmem_budget, max_lanes=2048, min_steps=4):
    """Largest 128-multiple divisor of hw_pad whose double-buffered in+out
    blocks fit `vmem_budget`, preferring a split that yields >= min_steps grid
    steps (v7x has 2 TensorCores; small-batch inference needs hw splitting)."""
    cands = [b for b in range(128, min(hw_pad, max_lanes) + 1, 128)
             if hw_pad % b == 0]
    if not cands:                                 # hw_pad is always a 128 multiple
        cands = [hw_pad]
    fits = [b for b in cands
            if 2 * b * (in_bytes_per_lane + out_bytes_per_lane) <= vmem_budget]
    if not fits:
        fits = cands[:1]
    stepped = [b for b in fits if n_batch * (hw_pad // b) >= min_steps]
    return max(stepped) if stepped else max(fits)


def _fuse_kernel(x_ref, w_ref, b_ref, out_ref, *, alpha, k, pad, t_f, t_out):
    # x_ref  : (1, C_f, T_f, hw_blk)      fast block, native channels-major layout
    # w_ref  : (K, C_out, C_f)            conv weight with BN scale folded in
    # b_ref  : (C_out, 1)                 folded BN shift
    # out_ref: (1, T_out, C_out, hw_blk)  time-major fused output block
    bias = b_ref[...]                                  # (C_out, 1), hoisted
    w_taps = [w_ref[kk] for kk in range(k)]            # each (C_out, C_f), tiny

    for t in range(t_out):                             # static unroll (t_out small)
        acc = None
        for kk in range(k):
            src_t = t * alpha + kk - pad
            if src_t < 0 or src_t >= t_f:
                continue                               # temporal zero padding (static)
            # Sublane-strided read of one frame; overlaps with the block DMA.
            part = jnp.dot(w_taps[kk], x_ref[0, :, src_t, :],
                           preferred_element_type=jnp.float32)
            acc = part if acc is None else acc + part
        if acc is None:                                # degenerate configs only
            acc = jnp.zeros(out_ref.shape[2:], jnp.float32)
        # Dense (C_out, hw_blk) tile store; the whole block leaves as one DMA.
        out_ref[0, t] = jnp.maximum(acc + bias, 0.0).astype(out_ref.dtype)


def fuse_fast_to_slow(x_s, x_f, conv_w, gamma, beta, run_mean, run_var, *,
                      alpha, fusion_kernel, eps=1e-5):
    """x_s: (N, C_s, T_s, H, W); x_f: (N, C_f, T_f, H, W); conv_w: (C_out, C_f, k, 1, 1)."""
    n, c_f, t_f, h, w = x_f.shape
    c_out = conv_w.shape[0]
    k = fusion_kernel
    pad = k // 2
    hw = h * w
    t_out = (t_f + 2 * pad - k) // alpha + 1

    # --- glue (no HBM transpose): flatten H,W; lane-pad to a 128 multiple ----
    xf = x_f.reshape(n, c_f, t_f, hw)                  # metadata-only reshape
    hw_pad = -(-hw // 128) * 128
    if hw_pad != hw:
        # Real SlowFast resolutions (56*56, 28*28, ...) are not 128 multiples;
        # pad lanes so every kernel load/store stays lane-aligned and dense.
        xf = jnp.pad(xf, ((0, 0), (0, 0), (0, 0), (0, hw_pad - hw)))

    # Inference-mode BN folded into conv weight + bias (kept in f32).
    scale = gamma / jnp.sqrt(run_var + eps)                            # (C_out,)
    shift = beta - run_mean * scale                                    # (C_out,)
    # conv_w: (C_out, C_in, K, 1, 1) -> (K, C_out, C_in), BN scale folded per C_out.
    w_taps = jnp.transpose(conv_w[:, :, :, 0, 0], (2, 0, 1)) * scale[None, :, None]
    b2 = shift[:, None]                                                # (C_out, 1)

    itemsize = jnp.dtype(xf.dtype).itemsize
    vmem_limit = _vmem_limit_bytes()
    hw_blk = _pick_hw_block(
        hw_pad, n,
        in_bytes_per_lane=t_f * c_f * itemsize,
        out_bytes_per_lane=t_out * c_out * itemsize,
        vmem_budget=vmem_limit // 2)
    n_hw = hw_pad // hw_blk

    # --- Pallas kernel: temporal conv + BN + ReLU, one step per (batch, hw tile)
    kern = functools.partial(_fuse_kernel, alpha=alpha, k=k, pad=pad,
                             t_f=t_f, t_out=t_out)
    fuse = pl.pallas_call(
        kern,
        out_shape=jax.ShapeDtypeStruct((n, t_out, c_out, hw_pad), x_f.dtype),
        grid_spec=pltpu.PrefetchScalarGridSpec(
            num_scalar_prefetch=0,
            grid=(n, n_hw),
            in_specs=[
                pl.BlockSpec((1, c_f, t_f, hw_blk), lambda b, j: (b, 0, 0, j)),
                pl.BlockSpec((k, c_out, c_f), lambda b, j: (0, 0, 0)),
                pl.BlockSpec((c_out, 1), lambda b, j: (0, 0)),
            ],
            out_specs=pl.BlockSpec((1, t_out, c_out, hw_blk),
                                   lambda b, j: (b, 0, 0, j)),
        ),
        compiler_params=pltpu.CompilerParams(
            # Both grid axes are independent (no cross-step accumulator):
            # let megacore (v7x) shard either one.
            dimension_semantics=("parallel", "parallel"),
            vmem_limit_bytes=vmem_limit),
    )(xf, w_taps, b2)

    # --- glue: back to NCTHW + concat with slow pathway ----------------------
    # Output-sized transpose (half the input traffic); expected to fuse into
    # the concatenate's copy.  If profiling shows otherwise, emit channels-major
    # directly from the kernel instead.
    fuse = jnp.transpose(fuse, (0, 2, 1, 3))[..., :hw]
    fuse = fuse.reshape(n, c_out, t_out, h, w)
    x_s_fuse = jnp.concatenate([x_s, fuse], axis=1)
    return [x_s_fuse, x_f]


def _reference(x_s, x_f, conv_w, gamma, beta, run_mean, run_var,
               *, alpha, fusion_kernel, eps=1e-5):
    pad = fusion_kernel // 2
    fuse = lax.conv_general_dilated(
        x_f, conv_w,
        window_strides=(alpha, 1, 1),
        padding=((pad, pad), (0, 0), (0, 0)),
        dimension_numbers=("NCDHW", "OIDHW", "NCDHW"))
    bcast = lambda v: v[None, :, None, None, None]
    fuse = (fuse - bcast(run_mean)) / jnp.sqrt(bcast(run_var) + eps)
    fuse = fuse * bcast(gamma) + bcast(beta)
    fuse = jnp.maximum(fuse, 0.0)
    return [jnp.concatenate([x_s, fuse], axis=1), x_f]


if __name__ == "__main__":
    # Module hyperparameters (SlowFast-style, small).
    dim_in = 8                      # fast-pathway channels
    fusion_conv_channel_ratio = 2
    fusion_kernel = 5
    alpha = 4
    eps = 1e-5
    c_out = dim_in * fusion_conv_channel_ratio

    # Small deterministic inputs.
    N, H, W = 2, 16, 16
    T_f = 16
    T_s = T_f // alpha              # slow pathway temporal length
    C_s = 32                        # slow-pathway channels

    key = jax.random.PRNGKey(0)
    k1, k2, k3, k4, k5, k6, k7 = jax.random.split(key, 7)
    x_s = jax.random.normal(k1, (N, C_s, T_s, H, W), jnp.float32)
    x_f = jax.random.normal(k2, (N, dim_in, T_f, H, W), jnp.float32)

    # Deterministic parameter init (shapes per nn.Conv3d / nn.BatchNorm3d).
    conv_w = 0.1 * jax.random.normal(k3, (c_out, dim_in, fusion_kernel, 1, 1), jnp.float32)
    gamma = 1.0 + 0.05 * jax.random.normal(k4, (c_out,), jnp.float32)
    beta = 0.05 * jax.random.normal(k5, (c_out,), jnp.float32)
    run_mean = 0.05 * jax.random.normal(k6, (c_out,), jnp.float32)
    run_var = jnp.abs(1.0 + 0.05 * jax.random.normal(k7, (c_out,), jnp.float32))

    out = fuse_fast_to_slow(x_s, x_f, conv_w, gamma, beta, run_mean, run_var,
                            alpha=alpha, fusion_kernel=fusion_kernel, eps=eps)
    out = [jax.block_until_ready(o) for o in out]

    ref = _reference(x_s, x_f, conv_w, gamma, beta, run_mean, run_var,
                     alpha=alpha, fusion_kernel=fusion_kernel, eps=eps)

    assert out[0].shape == (N, C_s + c_out, T_s, H, W), out[0].shape
    assert out[1].shape == x_f.shape
    assert jnp.allclose(out[0], ref[0], atol=1e-4, rtol=1e-4)
    assert jnp.allclose(out[1], ref[1])
    print("KERNEL_OK")
</pallas_src>

<mosaic_0001>
module attributes {stable_mosaic.version = 11 : i64} {
  func.func @_fuse_kernel(%arg0: i32, %arg1: i32, %arg2: memref<1x8x16x128xf32, #tpu.memory_space<vmem>>, %arg3: memref<5x16x8xf32, #tpu.memory_space<vmem>>, %arg4: memref<16x1xf32, #tpu.memory_space<vmem>>, %arg5: memref<1x4x16x128xf32, #tpu.memory_space<vmem>>) attributes {dimension_semantics = [#tpu.dimension_semantics<parallel>, #tpu.dimension_semantics<parallel>], iteration_bounds = array<i64: 2, 2>, scalar_prefetch = 0 : i64, scratch_operands = 0 : i64, tpu.core_type = #tpu.core_type<tc>, window_params = [{transform_indices = @transform_0, window_bounds = array<i64: 1, 8, 16, 128>}, {pipeline_mode = #tpu.pipeline_mode<synchronous>, transform_indices = @transform_1, window_bounds = array<i64: 5, 16, 8>}, {pipeline_mode = #tpu.pipeline_mode<synchronous>, transform_indices = @transform_2, window_bounds = array<i64: 16, 1>}, {transform_indices = @transform_3, window_bounds = array<i64: 1, 4, 16, 128>}]} {
    %c0 = arith.constant 0 : index
    %c0_0 = arith.constant 0 : index
    %0 = vector.load %arg4[%c0, %c0_0] : memref<16x1xf32, #tpu.memory_space<vmem>>, vector<16x1xf32>
    %c0_1 = arith.constant 0 : index
    %c0_2 = arith.constant 0 : index
    %c0_3 = arith.constant 0 : index
    %1 = vector.load %arg3[%c0_1, %c0_2, %c0_3] : memref<5x16x8xf32, #tpu.memory_space<vmem>>, vector<1x16x8xf32>
    %2 = vector.shape_cast %1 : vector<1x16x8xf32> to vector<16x8xf32>
    %c1 = arith.constant 1 : index
    %c0_4 = arith.constant 0 : index
    %c0_5 = arith.constant 0 : index
    %3 = vector.load %arg3[%c1, %c0_4, %c0_5] : memref<5x16x8xf32, #tpu.memory_space<vmem>>, vector<1x16x8xf32>
    %4 = vector.shape_cast %3 : vector<1x16x8xf32> to vector<16x8xf32>
    %c2 = arith.constant 2 : index
    %c0_6 = arith.constant 0 : index
    %c0_7 = arith.constant 0 : index
    %5 = vector.load %arg3[%c2, %c0_6, %c0_7] : memref<5x16x8xf32, #tpu.memory_space<vmem>>, vector<1x16x8xf32>
    %6 = vector.shape_cast %5 : vector<1x16x8xf32> to vector<16x8xf32>
    %c3 = arith.constant 3 : index
    %c0_8 = arith.constant 0 : index
    %c0_9 = arith.constant 0 : index
    %7 = vector.load %arg3[%c3, %c0_8, %c0_9] : memref<5x16x8xf32, #tpu.memory_space<vmem>>, vector<1x16x8xf32>
    %8 = vector.shape_cast %7 : vector<1x16x8xf32> to vector<16x8xf32>
    %c4 = arith.constant 4 : index
    %c0_10 = arith.constant 0 : index
    %c0_11 = arith.constant 0 : index
    %9 = vector.load %arg3[%c4, %c0_10, %c0_11] : memref<5x16x8xf32, #tpu.memory_space<vmem>>, vector<1x16x8xf32>
    %10 = vector.shape_cast %9 : vector<1x16x8xf32> to vector<16x8xf32>
    %c0_12 = arith.constant 0 : index
    %c0_13 = arith.constant 0 : index
    %c0_14 = arith.constant 0 : index
    %c0_15 = arith.constant 0 : index
    %11 = vector.load %arg2[%c0_12, %c0_13, %c0_14, %c0_15] : memref<1x8x16x128xf32, #tpu.memory_space<vmem>>, vector<1x8x1x128xf32>
    %12 = vector.shape_cast %11 : vector<1x8x1x128xf32> to vector<8x128xf32>
    %cst = arith.constant dense<0.000000e+00> : vector<16x128xf32>
    %13 = tpu.matmul %6, %12, %cst {dimension_numbers = #tpu.dot_dimension_numbers<[1], [0], [0], [1], [0, 0, 1, 1], [], []>} : vector<16x8xf32>, vector<8x128xf32>, vector<16x128xf32> -> vector<16x128xf32>
    %c0_16 = arith.constant 0 : index
    %c0_17 = arith.constant 0 : index
    %c1_18 = arith.constant 1 : index
    %c0_19 = arith.constant 0 : index
    %14 = vector.load %arg2[%c0_16, %c0_17, %c1_18, %c0_19] : memref<1x8x16x128xf32, #tpu.memory_space<vmem>>, vector<1x8x1x128xf32>
    %15 = vector.shape_cast %14 : vector<1x8x1x128xf32> to vector<8x128xf32>
    %cst_20 = arith.constant dense<0.000000e+00> : vector<16x128xf32>
    %16 = tpu.matmul %8, %15, %cst_20 {dimension_numbers = #tpu.dot_dimension_numbers<[1], [0], [0], [1], [0, 0, 1, 1], [], []>} : vector<16x8xf32>, vector<8x128xf32>, vector<16x128xf32> -> vector<16x128xf32>
    %17 = arith.addf %13, %16 : vector<16x128xf32>
    %c0_21 = arith.constant 0 : index
    %c0_22 = arith.constant 0 : index
    %c2_23 = arith.constant 2 : index
    %c0_24 = arith.constant 0 : index
    %18 = vector.load %arg2[%c0_21, %c0_22, %c2_23, %c0_24] : memref<1x8x16x128xf32, #tpu.memory_space<vmem>>, vector<1x8x1x128xf32>
    %19 = vector.shape_cast %18 : vector<1x8x1x128xf32> to vector<8x128xf32>
    %cst_25 = arith.constant dense<0.000000e+00> : vector<16x128xf32>
    %20 = tpu.matmul %10, %19, %cst_25 {dimension_numbers = #tpu.dot_dimension_numbers<[1], [0], [0], [1], [0, 0, 1, 1], [], []>} : vector<16x8xf32>, vector<8x128xf32>, vector<16x128xf32> -> vector<16x128xf32>
    %21 = arith.addf %17, %20 : vector<16x128xf32>
    %22 = vector.broadcast %0 : vector<16x1xf32> to vector<16x128xf32>
    %23 = arith.addf %21, %22 : vector<16x128xf32>
    %cst_26 = arith.constant 0.000000e+00 : f32
    %24 = vector.broadcast %cst_26 : f32 to vector<16x128xf32>
    %25 = arith.maximumf %23, %24 : vector<16x128xf32>
    %c0_27 = arith.constant 0 : index
    %c0_28 = arith.constant 0 : index
    %c0_29 = arith.constant 0 : index
    %c0_30 = arith.constant 0 : index
    %26 = vector.load %arg5[%c0_27, %c0_28, %c0_29, %c0_30] : memref<1x4x16x128xf32, #tpu.memory_space<vmem>>, vector<1x1x16x128xf32>
    %27 = vector.shape_cast %26 : vector<1x1x16x128xf32> to vector<16x128xf32>
    %28 = vector.shape_cast %25 : vector<16x128xf32> to vector<1x1x16x128xf32>
    tpu.vector_store %arg5[%c0_27, %c0_28, %c0_29, %c0_30], %28 {strides = array<i32>} : memref<1x4x16x128xf32, #tpu.memory_space<vmem>>, vector<1x1x16x128xf32>,
    %c0_31 = arith.constant 0 : index
    %c0_32 = arith.constant 0 : index
    %c2_33 = arith.constant 2 : index
    %c0_34 = arith.constant 0 : index
    %29 = vector.load %arg2[%c0_31, %c0_32, %c2_33, %c0_34] : memref<1x8x16x128xf32, #tpu.memory_space<vmem>>, vector<1x8x1x128xf32>
    %30 = vector.shape_cast %29 : vector<1x8x1x128xf32> to vector<8x128xf32>
    %cst_35 = arith.constant dense<0.000000e+00> : vector<16x128xf32>
    %31 = tpu.matmul %2, %30, %cst_35 {dimension_numbers = #tpu.dot_dimension_numbers<[1], [0], [0], [1], [0, 0, 1, 1], [], []>} : vector<16x8xf32>, vector<8x128xf32>, vector<16x128xf32> -> vector<16x128xf32>
    %c0_36 = arith.constant 0 : index
    %c0_37 = arith.constant 0 : index
    %c3_38 = arith.constant 3 : index
    %c0_39 = arith.constant 0 : index
    %32 = vector.load %arg2[%c0_36, %c0_37, %c3_38, %c0_39] : memref<1x8x16x128xf32, #tpu.memory_space<vmem>>, vector<1x8x1x128xf32>
    %33 = vector.shape_cast %32 : vector<1x8x1x128xf32> to vector<8x128xf32>
    %cst_40 = arith.constant dense<0.000000e+00> : vector<16x128xf32>
    %34 = tpu.matmul %4, %33, %cst_40 {dimension_numbers = #tpu.dot_dimension_numbers<[1], [0], [0], [1], [0, 0, 1, 1], [], []>} : vector<16x8xf32>, vector<8x128xf32>, vector<16x128xf32> -> vector<16x128xf32>
    %35 = arith.addf %31, %34 : vector<16x128xf32>
    %c0_41 = arith.constant 0 : index
    %c0_42 = arith.constant 0 : index
    %c4_43 = arith.constant 4 : index
    %c0_44 = arith.constant 0 : index
    %36 = vector.load %arg2[%c0_41, %c0_42, %c4_43, %c0_44] : memref<1x8x16x128xf32, #tpu.memory_space<vmem>>, vector<1x8x1x128xf32>
    %37 = vector.shape_cast %36 : vector<1x8x1x128xf32> to vector<8x128xf32>
    %cst_45 = arith.constant dense<0.000000e+00> : vector<16x128xf32>
    %38 = tpu.matmul %6, %37, %cst_45 {dimension_numbers = #tpu.dot_dimension_numbers<[1], [0], [0], [1], [0, 0, 1, 1], [], []>} : vector<16x8xf32>, vector<8x128xf32>, vector<16x128xf32> -> vector<16x128xf32>
    %39 = arith.addf %35, %38 : vector<16x128xf32>
    %c0_46 = arith.constant 0 : index
    %c0_47 = arith.constant 0 : index
    %c5 = arith.constant 5 : index
    %c0_48 = arith.constant 0 : index
    %40 = vector.load %arg2[%c0_46, %c0_47, %c5, %c0_48] : memref<1x8x16x128xf32, #tpu.memory_space<vmem>>, vector<1x8x1x128xf32>
    %41 = vector.shape_cast %40 : vector<1x8x1x128xf32> to vector<8x128xf32>
    %cst_49 = arith.constant dense<0.000000e+00> : vector<16x128xf32>
    %42 = tpu.matmul %8, %41, %cst_49 {dimension_numbers = #tpu.dot_dimension_numbers<[1], [0], [0], [1], [0, 0, 1, 1], [], []>} : vector<16x8xf32>, vector<8x128xf32>, vector<16x128xf32> -> vector<16x128xf32>
    %43 = arith.addf %39, %42 : vector<16x128xf32>
    %c0_50 = arith.constant 0 : index
    %c0_51 = arith.constant 0 : index
    %c6 = arith.constant 6 : index
    %c0_52 = arith.constant 0 : index
    %44 = vector.load %arg2[%c0_50, %c0_51, %c6, %c0_52] : memref<1x8x16x128xf32, #tpu.memory_space<vmem>>, vector<1x8x1x128xf32>
    %45 = vector.shape_cast %44 : vector<1x8x1x128xf32> to vector<8x128xf32>
    %cst_53 = arith.constant dense<0.000000e+00> : vector<16x128xf32>
    %46 = tpu.matmul %10, %45, %cst_53 {dimension_numbers = #tpu.dot_dimension_numbers<[1], [0], [0], [1], [0, 0, 1, 1], [], []>} : vector<16x8xf32>, vector<8x128xf32>, vector<16x128xf32> -> vector<16x128xf32>
    %47 = arith.addf %43, %46 : vector<16x128xf32>
    %48 = vector.broadcast %0 : vector<16x1xf32> to vector<16x128xf32>
    %49 = arith.addf %47, %48 : vector<16x128xf32>
    %cst_54 = arith.constant 0.000000e+00 : f32
    %50 = vector.broadcast %cst_54 : f32 to vector<16x128xf32>
    %51 = arith.maximumf %49, %50 : vector<16x128xf32>
    %c0_55 = arith.constant 0 : index
    %c1_56 = arith.constant 1 : index
    %c0_57 = arith.constant 0 : index
    %c0_58 = arith.constant 0 : index
    %52 = vector.load %arg5[%c0_55, %c1_56, %c0_57, %c0_58] : memref<1x4x16x128xf32, #tpu.memory_space<vmem>>, vector<1x1x16x128xf32>
    %53 = vector.shape_cast %52 : vector<1x1x16x128xf32> to vector<16x128xf32>
    %54 = vector.shape_cast %51 : vector<16x128xf32> to vector<1x1x16x128xf32>
    tpu.vector_store %arg5[%c0_55, %c1_56, %c0_57, %c0_58], %54 {strides = array<i32>} : memref<1x4x16x128xf32, #tpu.memory_space<vmem>>, vector<1x1x16x128xf32>,
    %c0_59 = arith.constant 0 : index
    %c0_60 = arith.constant 0 : index
    %c6_61 = arith.constant 6 : index
    %c0_62 = arith.constant 0 : index
    %55 = vector.load %arg2[%c0_59, %c0_60, %c6_61, %c0_62] : memref<1x8x16x128xf32, #tpu.memory_space<vmem>>, vector<1x8x1x128xf32>
    %56 = vector.shape_cast %55 : vector<1x8x1x128xf32> to vector<8x128xf32>
    %cst_63 = arith.constant dense<0.000000e+00> : vector<16x128xf32>
    %57 = tpu.matmul %2, %56, %cst_63 {dimension_numbers = #tpu.dot_dimension_numbers<[1], [0], [0], [1], [0, 0, 1, 1], [], []>} : vector<16x8xf32>, vector<8x128xf32>, vector<16x128xf32> -> vector<16x128xf32>
    %c0_64 = arith.constant 0 : index
    %c0_65 = arith.constant 0 : index
    %c7 = arith.constant 7 : index
    %c0_66 = arith.constant 0 : index
    %58 = vector.load %arg2[%c0_64, %c0_65, %c7, %c0_66] : memref<1x8x16x128xf32, #tpu.memory_space<vmem>>, vector<1x8x1x128xf32>
    %59 = vector.shape_cast %58 : vector<1x8x1x128xf32> to vector<8x128xf32>
    %cst_67 = arith.constant dense<0.000000e+00> : vector<16x128xf32>
    %60 = tpu.matmul %4, %59, %cst_67 {dimension_numbers = #tpu.dot_dimension_numbers<[1], [0], [0], [1], [0, 0, 1, 1], [], []>} : vector<16x8xf32>, vector<8x128xf32>, vector<16x128xf32> -> vector<16x128xf32>
    %61 = arith.addf %57, %60 : vector<16x128xf32>
    %c0_68 = arith.constant 0 : index
    %c0_69 = arith.constant 0 : index
    %c8 = arith.constant 8 : index
    %c0_70 = arith.constant 0 : index
    %62 = vector.load %arg2[%c0_68, %c0_69, %c8, %c0_70] : memref<1x8x16x128xf32, #tpu.memory_space<vmem>>, vector<1x8x1x128xf32>
    %63 = vector.shape_cast %62 : vector<1x8x1x128xf32> to vector<8x128xf32>
    %cst_71 = arith.constant dense<0.000000e+00> : vector<16x128xf32>
    %64 = tpu.matmul %6, %63, %cst_71 {dimension_numbers = #tpu.dot_dimension_numbers<[1], [0], [0], [1], [0, 0, 1, 1], [], []>} : vector<16x8xf32>, vector<8x128xf32>, vector<16x128xf32> -> vector<16x128xf32>
    %65 = arith.addf %61, %64 : vector<16x128xf32>
    %c0_72 = arith.constant 0 : index
    %c0_73 = arith.constant 0 : index
    %c9 = arith.constant 9 : index
    %c0_74 = arith.constant 0 : index
    %66 = vector.load %arg2[%c0_72, %c0_73, %c9, %c0_74] : memref<1x8x16x128xf32, #tpu.memory_space<vmem>>, vector<1x8x1x128xf32>
    %67 = vector.shape_cast %66 : vector<1x8x1x128xf32> to vector<8x128xf32>
    %cst_75 = arith.constant dense<0.000000e+00> : vector<16x128xf32>
    %68 = tpu.matmul %8, %67, %cst_75 {dimension_numbers = #tpu.dot_dimension_numbers<[1], [0], [0], [1], [0, 0, 1, 1], [], []>} : vector<16x8xf32>, vector<8x128xf32>, vector<16x128xf32> -> vector<16x128xf32>
    %69 = arith.addf %65, %68 : vector<16x128xf32>
    %c0_76 = arith.constant 0 : index
    %c0_77 = arith.constant 0 : index
    %c10 = arith.constant 10 : index
    %c0_78 = arith.constant 0 : index
    %70 = vector.load %arg2[%c0_76, %c0_77, %c10, %c0_78] : memref<1x8x16x128xf32, #tpu.memory_space<vmem>>, vector<1x8x1x128xf32>
    %71 = vector.shape_cast %70 : vector<1x8x1x128xf32> to vector<8x128xf32>
    %cst_79 = arith.constant dense<0.000000e+00> : vector<16x128xf32>
    %72 = tpu.matmul %10, %71, %cst_79 {dimension_numbers = #tpu.dot_dimension_numbers<[1], [0], [0], [1], [0, 0, 1, 1], [], []>} : vector<16x8xf32>, vector<8x128xf32>, vector<16x128xf32> -> vector<16x128xf32>
    %73 = arith.addf %69, %72 : vector<16x128xf32>
    %74 = vector.broadcast %0 : vector<16x1xf32> to vector<16x128xf32>
    %75 = arith.addf %73, %74 : vector<16x128xf32>
    %cst_80 = arith.constant 0.000000e+00 : f32
    %76 = vector.broadcast %cst_80 : f32 to vector<16x128xf32>
    %77 = arith.maximumf %75, %76 : vector<16x128xf32>
    %c0_81 = arith.constant 0 : index
    %c2_82 = arith.constant 2 : index
    %c0_83 = arith.constant 0 : index
    %c0_84 = arith.constant 0 : index
    %78 = vector.load %arg5[%c0_81, %c2_82, %c0_83, %c0_84] : memref<1x4x16x128xf32, #tpu.memory_space<vmem>>, vector<1x1x16x128xf32>
    %79 = vector.shape_cast %78 : vector<1x1x16x128xf32> to vector<16x128xf32>
    %80 = vector.shape_cast %77 : vector<16x128xf32> to vector<1x1x16x128xf32>
    tpu.vector_store %arg5[%c0_81, %c2_82, %c0_83, %c0_84], %80 {strides = array<i32>} : memref<1x4x16x128xf32, #tpu.memory_space<vmem>>, vector<1x1x16x128xf32>,
    %c0_85 = arith.constant 0 : index
    %c0_86 = arith.constant 0 : index
    %c10_87 = arith.constant 10 : index
    %c0_88 = arith.constant 0 : index
    %81 = vector.load %arg2[%c0_85, %c0_86, %c10_87, %c0_88] : memref<1x8x16x128xf32, #tpu.memory_space<vmem>>, vector<1x8x1x128xf32>
    %82 = vector.shape_cast %81 : vector<1x8x1x128xf32> to vector<8x128xf32>
    %cst_89 = arith.constant dense<0.000000e+00> : vector<16x128xf32>
    %83 = tpu.matmul %2, %82, %cst_89 {dimension_numbers = #tpu.dot_dimension_numbers<[1], [0], [0], [1], [0, 0, 1, 1], [], []>} : vector<16x8xf32>, vector<8x128xf32>, vector<16x128xf32> -> vector<16x128xf32>
    %c0_90 = arith.constant 0 : index
    %c0_91 = arith.constant 0 : index
    %c11 = arith.constant 11 : index
    %c0_92 = arith.constant 0 : index
    %84 = vector.load %arg2[%c0_90, %c0_91, %c11, %c0_92] : memref<1x8x16x128xf32, #tpu.memory_space<vmem>>, vector<1x8x1x128xf32>
    %85 = vector.shape_cast %84 : vector<1x8x1x128xf32> to vector<8x128xf32>
    %cst_93 = arith.constant dense<0.000000e+00> : vector<16x128xf32>
    %86 = tpu.matmul %4, %85, %cst_93 {dimension_numbers = #tpu.dot_dimension_numbers<[1], [0], [0], [1], [0, 0, 1, 1], [], []>} : vector<16x8xf32>, vector<8x128xf32>, vector<16x128xf32> -> vector<16x128xf32>
    %87 = arith.addf %83, %86 : vector<16x128xf32>
    %c0_94 = arith.constant 0 : index
    %c0_95 = arith.constant 0 : index
    %c12 = arith.constant 12 : index
    %c0_96 = arith.constant 0 : index
    %88 = vector.load %arg2[%c0_94, %c0_95, %c12, %c0_96] : memref<1x8x16x128xf32, #tpu.memory_space<vmem>>, vector<1x8x1x128xf32>
    %89 = vector.shape_cast %88 : vector<1x8x1x128xf32> to vector<8x128xf32>
    %cst_97 = arith.constant dense<0.000000e+00> : vector<16x128xf32>
    %90 = tpu.matmul %6, %89, %cst_97 {dimension_numbers = #tpu.dot_dimension_numbers<[1], [0], [0], [1], [0, 0, 1, 1], [], []>} : vector<16x8xf32>, vector<8x128xf32>, vector<16x128xf32> -> vector<16x128xf32>
    %91 = arith.addf %87, %90 : vector<16x128xf32>
    %c0_98 = arith.constant 0 : index
    %c0_99 = arith.constant 0 : index
    %c13 = arith.constant 13 : index
    %c0_100 = arith.constant 0 : index
    %92 = vector.load %arg2[%c0_98, %c0_99, %c13, %c0_100] : memref<1x8x16x128xf32, #tpu.memory_space<vmem>>, vector<1x8x1x128xf32>
    %93 = vector.shape_cast %92 : vector<1x8x1x128xf32> to vector<8x128xf32>
    %cst_101 = arith.constant dense<0.000000e+00> : vector<16x128xf32>
    %94 = tpu.matmul %8, %93, %cst_101 {dimension_numbers = #tpu.dot_dimension_numbers<[1], [0], [0], [1], [0, 0, 1, 1], [], []>} : vector<16x8xf32>, vector<8x128xf32>, vector<16x128xf32> -> vector<16x128xf32>
    %95 = arith.addf %91, %94 : vector<16x128xf32>
    %c0_102 = arith.constant 0 : index
    %c0_103 = arith.constant 0 : index
    %c14 = arith.constant 14 : index
    %c0_104 = arith.constant 0 : index
    %96 = vector.load %arg2[%c0_102, %c0_103, %c14, %c0_104] : memref<1x8x16x128xf32, #tpu.memory_space<vmem>>, vector<1x8x1x128xf32>
    %97 = vector.shape_cast %96 : vector<1x8x1x128xf32> to vector<8x128xf32>
    %cst_105 = arith.constant dense<0.000000e+00> : vector<16x128xf32>
    %98 = tpu.matmul %10, %97, %cst_105 {dimension_numbers = #tpu.dot_dimension_numbers<[1], [0], [0], [1], [0, 0, 1, 1], [], []>} : vector<16x8xf32>, vector<8x128xf32>, vector<16x128xf32> -> vector<16x128xf32>
    %99 = arith.addf %95, %98 : vector<16x128xf32>
    %100 = vector.broadcast %0 : vector<16x1xf32> to vector<16x128xf32>
    %101 = arith.addf %99, %100 : vector<16x128xf32>
    %cst_106 = arith.constant 0.000000e+00 : f32
    %102 = vector.broadcast %cst_106 : f32 to vector<16x128xf32>
    %103 = arith.maximumf %101, %102 : vector<16x128xf32>
    %c0_107 = arith.constant 0 : index
    %c3_108 = arith.constant 3 : index
    %c0_109 = arith.constant 0 : index
    %c0_110 = arith.constant 0 : index
    %104 = vector.load %arg5[%c0_107, %c3_108, %c0_109, %c0_110] : memref<1x4x16x128xf32, #tpu.memory_space<vmem>>, vector<1x1x16x128xf32>
    %105 = vector.shape_cast %104 : vector<1x1x16x128xf32> to vector<16x128xf32>
    %106 = vector.shape_cast %103 : vector<16x128xf32> to vector<1x1x16x128xf32>
    tpu.vector_store %arg5[%c0_107, %c3_108, %c0_109, %c0_110], %106 {strides = array<i32>} : memref<1x4x16x128xf32, #tpu.memory_space<vmem>>, vector<1x1x16x128xf32>,
    return
  }
  func.func @transform_0(%arg0: i32, %arg1: i32) -> (i32, i32, i32, i32) {
    %c0_i32 = arith.constant 0 : i32
    %c0_i32_0 = arith.constant 0 : i32
    %c0_i32_1 = arith.constant 0 : i32
    return %arg0, %c0_i32, %c0_i32_0, %arg1 : i32, i32, i32, i32
  }
  func.func @transform_1(%arg0: i32, %arg1: i32) -> (i32, i32, i32) {
    %c0_i32 = arith.constant 0 : i32
    %c0_i32_0 = arith.constant 0 : i32
    %c0_i32_1 = arith.constant 0 : i32
    %c0_i32_2 = arith.constant 0 : i32
    return %c0_i32, %c0_i32_0, %c0_i32_1 : i32, i32, i32
  }
  func.func @transform_2(%arg0: i32, %arg1: i32) -> (i32, i32) {
    %c0_i32 = arith.constant 0 : i32
    %c0_i32_0 = arith.constant 0 : i32
    %c0_i32_1 = arith.constant 0 : i32
    return %c0_i32, %c0_i32_0 : i32, i32
  }
  func.func @transform_3(%arg0: i32, %arg1: i32) -> (i32, i32, i32, i32) {
    %c0_i32 = arith.constant 0 : i32
    %c0_i32_0 = arith.constant 0 : i32
    %c0_i32_1 = arith.constant 0 : i32
    return %arg0, %c0_i32, %c0_i32_0, %arg1 : i32, i32, i32, i32
  }
}

</mosaic_0001>

<bundles_post_ra>
// kernel: tpu_custom_call.1
= control target key start
LH: loop header
LB: loop body
LE: loop exit
PB: predicated region body
PF: predicated region fallthrough
CT: control target
= control target key end

     0   :  { %8 = vsyncpa [#allocation3], 0  ;;  %s2272_s0 = inlined_call_operand.hbm [shape: f32[2,8,16,256], index: 0, kind: input, shape index: {}]   ;;  %s2273_s1 = inlined_call_operand.vmem [shape: f32[5,16,8], index: 1, kind: input, shape index: {}]   ;;  %s2274_s2 = inlined_call_operand.vmem [shape: f32[16,1], index: 2, kind: input, shape index: {}]   ;;  %s2275_s3 = inlined_call_operand.hbm [shape: f32[2,4,16,256], index: 3, kind: output, shape index: {}]  }
   0x1   :  { %10 = vsyncpa [#allocation3 + $0x1], 0 }
   0x2   :  { %11 = vsyncpa [#allocation4], 0 }
   0x3   :  { %13 = vsyncpa [#allocation4 + $0x1], 0  ;;  %s1706_s12 = smov 0   ;;  %s1708_s13 = smov 0  }
   0x4   :  { %s1710_s14 = smov 0   ;;  %s1712_s15 = smov 0  }
   0x5   :  { %s1714_s16 = smov 0   ;;  %s1716_s17 = smov 0  }
   0x6   :  { %s1718_s18 = smov 0   ;;  %s1720_s19 = smov 0  }
   0x7 LB: > { %s1396_s20 = sadd.s32 4294967295, %s1677_s19   ;;  %s1397_s21 = sadd.s32 4294967294, %s1677_s19   ;;  %s1677_s19 = sphi %s1720_s19, %s19_s19   ;;  %s1673_s18 = sphi %s1718_s18, %s2294_s18   ;;  %s1669_s17 = sphi %s1716_s17, %s2293_s17   ;;  %s1665_s16 = sphi %s1714_s16, %s2292_s16   ;;  %s1661_s15 = sphi %s1712_s15, %s2291_s15   ;;  %s1657_s14 = sphi %s1710_s14, %s2290_s14   ;;  %s1653_s13 = sphi %s1708_s13, %s2289_s13   ;;  %s1649_s12 = sphi %s1706_s12, %s2288_s12  }
   0x8   : > { %s28_s22 = sadd.s32 1, %s1669_s17  ;;  %s31_s23 = sadd.s32 1, %s1673_s18 }
   0x9   : > { %p29_p0 = scmp.ge.s32.totalorder %s28_s22, 2  ;;  %s40_s24 = sadd.s32 1, %s1657_s14 }
   0xa   : > { %p47_p1 = scmp.ne.s32.totalorder %s1657_s14, %s1653_s13  ;;  %p48_p2 = scmp.eq.s32.totalorder %s1677_s19, 0 }
   0xb   : > { %s2296_s22 = smov (%p29_p0, %s28_s22), 0  ;;  %s2298_s23 = smov (!%p29_p0, %s31_s23), %s1673_s18 }
   0xc   : > { %2278 = sst [smem:[#allocation8_spill]] %s2296_s22  ;;  %s36_s25 = ssub.s32 %s1669_s17, %s2296_s22 }
   0xd   : > { %p1759_p3 = por %p48_p2, %p47_p1  ;;  %p33_p4 = scmp.ge.s32.totalorder %s2298_s23, 2 }
   0xe   : > { %p53_p5 = scmp.ne.s32.totalorder %s1653_s13, %s1649_s12  ;;  %p54_p6 = scmp.eq.s32.totalorder %s1396_s20, 0 }
   0xf   : > { %p121_p7 = scmp.eq.s32.totalorder %s1396_s20, 3  ;;  %s2300_s23 = smov (%p33_p4, %s2298_s23), 0 }
  0x10   : > { %2280 = sst [smem:[#allocation9_spill]] %s2300_s23  ;;  %p1767_p8 = por %p54_p6, %p53_p5 }
  0x11   : > { %p1771_p9 = por %p121_p7, %p47_p1  ;;  %s35_s29 = ssub.s32 %s1673_s18, %s2300_s23 }
  0x12   : > { %p127_p10 = scmp.eq.s32.totalorder %s1397_s21, 3  ;;  %s37_s30 = sor.u32 %s36_s25, %s35_s29 }
  0x13   : > { %p38_p11 = scmp.eq.s32.totalorder %s37_s30, 0  ;;  %p1475_p13 = scmp.lt.s32.totalorder %s1677_s19, 4 }
  0x14   : > { %p1777_p12 = por %p127_p10, %p53_p5  ;;  %s153_s5 = sand.u32 1, %s1657_s14  }
  0x15   : > { %s1784_s6 = scalar_select %p38_p11, %s1657_s14, %s40_s24  }
  0x16   : > { %s1400_s7 = sshll.u32 %s153_s5, 7  ;;  %s1401_s8 = sshll.u32 %s1673_s18, 5 }
  0x17   : > { %2284 = sst [smem:[#allocation10_spill]] %s1784_s6  ;;  %s161_s9 = sadd.s32 %s1669_s17, %s1401_s8 }
  0x18   : > { %s157_s10 = scalar_lea.vmem [#allocation2], %s1400_s7  ;;  %s1402_s20 = sshll.u32 %s161_s9, 3 }
  0x19   : > { %s166_s11 = sshll.u32 %s157_s10, 4  ;;  %s163_s29 = scalar_lea.hbm %s2272_s0, %s1402_s20  ;;  %s167_s11 = int_to_ptr.vmem [resolvable:$true] %s166_s11 }
  0x1a   : > { %p1468_p0 = pnand %p1475_p13, %p1759_p3  ;;  %s164_s30 = sshll.u32 %s163_s29, 4  ;;  %s165_s30 = int_to_ptr.hbm [resolvable:$true] %s164_s30 }
  0x1b   : > { %s154_s23 = scalar_lea.sflag [#allocation3], %s153_s5  ;;  %s1679_s24 = smov 256  }
  0x1c   : > { %s1680_s22 = smov 128   ;;  %s1681_s6 = smov 8  }
  0x1d   : > { %1470 = dma.hbm_to_vmem [thread:$0]  (!%p1468_p0), %s165_s30, 2048, %s167_s11, %s154_s23, %s1679_s24, %s1680_s22, %s1681_s6  }
  0x1e   : > { %p1403_p1 = scmp.ge.s32.totalorder %s1677_s19, 1  ;;  %p174_p2 = scmp.lt.s32.totalorder %s1677_s19, 5 }
  0x20   : > { %p175_p4 = pnand %p1403_p1, %p174_p2 }
  0x21   : > { %s1796_s7 = sand.u32 (!%p175_p4), 1, %s1653_s13  }
  0x22   : > { %178 = sbr.rel (%p175_p4) target bundleno = 275 (0x113), region = 32  ;;  %s1404_s8 = sshll.u32 (!%p175_p4), %s1796_s7, 7 }
  0x23   : > { %s181_s26 = scalar_lea.sflag (!%p175_p4), [#allocation3], %s1796_s7  ;;  %s1800_s9 = scalar_lea.vmem (!%p175_p4), [#allocation2], %s1404_s8 }
  0x27   : > { %1640 = dma.done.wait (%p1767_p8), %s181_s26, 2048  }
  0x28   : > { %1642 = vsyncadd (%p1767_p8), %s181_s26, 4294965248  ;;  %vm249_vm0 = vcmask 1041409   ;;  %vm252_vm1 = vcmask 1042434   ;;  %vm255_vm2 = vcmask 1043459   ;;  %vm258_vm3 = vcmask 1044484   ;;  %v1829_v32 = vld [vmem:[%s2273_s1 + $0x38] sm:$0xff] }
  0x29   : > { %vm261_vm4 = vcmask 1045509   ;;  %vm264_vm5 = vcmask 1046534   ;;  %vm267_vm6 = vcmask 1047559   ;;  %v232_v0 = vld [vmem:[%s1800_s9 + $0x1] sm:$0x1]  ;;  %vm270_vm7 = vcmask 64512  }
  0x2a   : > { %v233_v1 = vld [vmem:[%s1800_s9 + $0x11] sm:$0x1]  ;;  %v234_v2 = vld [vmem:[%s1800_s9 + $0x21] sm:$0x1]  ;;  %v224_v13 = vld [vmem:[%s1800_s9] sm:$0x1] }
  0x2b   : > { %v235_v3 = vld [vmem:[%s1800_s9 + $0x31] sm:$0x1]  ;;  %v236_v4 = vld [vmem:[%s1800_s9 + $0x41] sm:$0x1]  ;;  %v248_v8 = vrot.slane %v233_v1, 7  ;;  %v251_v9 = vrot.slane %v234_v2, 6 }
  0x2c   : > { %v237_v5 = vld [vmem:[%s1800_s9 + $0x51] sm:$0x1]  ;;  %v238_v6 = vld [vmem:[%s1800_s9 + $0x61] sm:$0x1]  ;;  %v254_v10 = vrot.slane %v235_v3, 5  ;;  %v257_v11 = vrot.slane %v236_v4, 4 }
  0x2d   : > { %v239_v7 = vld [vmem:[%s1800_s9 + $0x71] sm:$0x1]  ;;  %v260_v12 = vrot.slane %v237_v5, 3  ;;  %v250_v14 = vsel %vm249_vm0, %v248_v8, %v232_v0  ;;  %v263_v15 = vrot.slane %v238_v6, 2  ;;  %v225_v17 = vld [vmem:[%s1800_s9 + $0x10] sm:$0x1] }
  0x2e   : > { %v266_v16 = vrot.slane %v239_v7, 1  ;;  %v226_v18 = vld [vmem:[%s1800_s9 + $0x20] sm:$0x1]  ;;  %v253_v19 = vsel %vm252_vm1, %v251_v9, %v250_v14  ;;  %v227_v20 = vld [vmem:[%s1800_s9 + $0x30] sm:$0x1]  ;;  %v308_v26 = vrot.slane %v225_v17, 7 }
  0x2f   : > { %v228_v21 = vld [vmem:[%s1800_s9 + $0x40] sm:$0x1]  ;;  %v229_v22 = vld [vmem:[%s1800_s9 + $0x50] sm:$0x1]  ;;  %v256_v23 = vsel %vm255_vm2, %v254_v10, %v253_v19  ;;  %v310_v27 = vrot.slane %v226_v18, 6  ;;  %v312_v29 = vrot.slane %v227_v20, 5 }
  0x30   : > { %v230_v24 = vld [vmem:[%s1800_s9 + $0x60] sm:$0x1]  ;;  %v231_v25 = vld [vmem:[%s1800_s9 + $0x70] sm:$0x1]  ;;  %v259_v28 = vsel %vm258_vm3, %v257_v11, %v256_v23  ;;  %v314_v30 = vrot.slane %v228_v21, 4  ;;  %v316_v31 = vrot.slane %v229_v22, 3  ;;  %v309_v35 = vsel %vm249_vm0, %v308_v26, %v224_v13 }
  0x31   : > { %v352_v33 = vld [vmem:[%s1800_s9 + $0x2] sm:$0x1]  ;;  %v262_v34 = vsel %vm261_vm4, %v260_v12, %v259_v28  ;;  %v318_v36 = vrot.slane %v230_v24, 2  ;;  %v320_v37 = vrot.slane %v231_v25, 1  ;;  %v353_v38 = vld [vmem:[%s1800_s9 + $0x12] sm:$0x1]  ;;  %v311_v41 = vsel %vm252_vm1, %v310_v27, %v309_v35 }
  0x32   : > { %v354_v39 = vld [vmem:[%s1800_s9 + $0x22] sm:$0x1]  ;;  %v265_v40 = vsel %vm264_vm5, %v263_v15, %v262_v34  ;;  %v355_v42 = vld [vmem:[%s1800_s9 + $0x32] sm:$0x1]  ;;  %v313_v46 = vsel %vm255_vm2, %v312_v29, %v311_v41  ;;  %v368_v49 = vrot.slane %v353_v38, 7  ;;  %v1849_v52 = vld [vmem:[%s2273_s1 + $0x28] sm:$0xff] }
  0x33   : > { %v356_v43 = vld [vmem:[%s1800_s9 + $0x42] sm:$0x1]  ;;  %v357_v44 = vld [vmem:[%s1800_s9 + $0x52] sm:$0x1]  ;;  %v268_v45 = vsel %vm267_vm6, %v266_v16, %v265_v40  ;;  %v370_v50 = vrot.slane %v354_v39, 6  ;;  %v315_v51 = vsel %vm258_vm3, %v314_v30, %v313_v46  ;;  %v372_v53 = vrot.slane %v355_v42, 5 }
  0x34   : > { %v358_v47 = vld [vmem:[%s1800_s9 + $0x62] sm:$0x1]  ;;  %v359_v48 = vld [vmem:[%s1800_s9 + $0x72] sm:$0x1]  ;;  %1461 = vmatpush.msra.mxu2 %v268_v45  ;;  %v374_v54 = vrot.slane %v356_v43, 4  ;;  %v376_v55 = vrot.slane %v357_v44, 3  ;;  %292 = vmatpush.msra.mxu0 %v268_v45  ;;  %v317_v58 = vsel %vm261_vm4, %v316_v31, %v315_v51  ;;  %v369_v59 = vsel %vm249_vm0, %v368_v49, %v352_v33 }
  0x35   : > { %v438_v56 = vld [vmem:[%s1800_s9 + $0x3] sm:$0x1]  ;;  %v1855_v57 = vld [vmem:[%s2273_s1 + $0x30] sm:$0xff]  ;;  %1415 = vmatmul.msk.f32.vlgmr.msra.gmra.mxu2 %vm270_vm7, %v1829_v32  ;;  %v378_v60 = vrot.slane %v358_v47, 2  ;;  %v380_v61 = vrot.slane %v359_v48, 1  ;;  %v319_v0 = vsel %vm264_vm5, %v318_v36, %v317_v58  ;;  %v371_v1 = vsel %vm252_vm1, %v370_v50, %v369_v59  ;;  %s1457_s29 = sshll.u32 %s1665_s16, 4 }
  0x36   : > { %v439_v62 = vld [vmem:[%s1800_s9 + $0x13] sm:$0x1]  ;;  %v440_v63 = vld [vmem:[%s1800_s9 + $0x23] sm:$0x1]  ;;  %1414 = vmatmul.msk.f32.vlgmr.msra.gmra.mxu0 %vm270_vm7, %v1855_v57  ;;  %v321_v5 = vsel %vm267_vm6, %v320_v37, %v319_v0  ;;  %v373_v6 = vsel %vm255_vm2, %v372_v53, %v371_v1  ;;  %v606_v16 = vld [vmem:[%s1800_s9 + $0x5] sm:$0x1]  ;;  %s1302_s30 = sadd.s32 %s1661_s15, %s1457_s29 }
  0x37   : > { %v441_v2 = vld [vmem:[%s1800_s9 + $0x33] sm:$0x1]  ;;  %v442_v3 = vld [vmem:[%s1800_s9 + $0x43] sm:$0x1]  ;;  %v454_v9 = vrot.slane %v439_v62, 7  ;;  %v456_v10 = vrot.slane %v440_v63, 6  ;;  %1462 = vmatpush.msra.mxu3 %v321_v5  ;;  %v375_v11 = vsel %vm258_vm3, %v374_v54, %v373_v6  ;;  %344 = vmatpush.msra.mxu1 %v321_v5 }
  0x38   : > { %v443_v4 = vld [vmem:[%s1800_s9 + $0x53] sm:$0x1]  ;;  %v444_v7 = vld [vmem:[%s1800_s9 + $0x63] sm:$0x1]  ;;  %v458_v12 = vrot.slane %v441_v2, 5  ;;  %v460_v13 = vrot.slane %v442_v3, 4  ;;  %1417 = vmatmul.msk.f32.vlgmr.msra.gmra.mxu3 %vm270_vm7, %v1849_v52  ;;  %v377_v17 = vsel %vm261_vm4, %v376_v55, %v375_v11 }
  0x39   : > { %v445_v8 = vld [vmem:[%s1800_s9 + $0x73] sm:$0x1]  ;;  %v462_v14 = vrot.slane %v443_v4, 3  ;;  %v1878_v15 = vld [vmem:[%s2273_s1 + $0x40] sm:$0xff]  ;;  %v455_v18 = vsel %vm249_vm0, %v454_v9, %v438_v56  ;;  %v464_v19 = vrot.slane %v444_v7, 2  ;;  %v379_v23 = vsel %vm264_vm5, %v378_v60, %v377_v17  ;;  %v1934_v5 = vld [vmem:[%s2273_s1 + $0x48] sm:$0xff] }
  0x3a   : > { %v466_v20 = vrot.slane %v445_v8, 1  ;;  %v607_v21 = vld [vmem:[%s1800_s9 + $0x15] sm:$0x1]  ;;  %v608_v22 = vld [vmem:[%s1800_s9 + $0x25] sm:$0x1]  ;;  %v457_v24 = vsel %vm252_vm1, %v456_v10, %v455_v18  ;;  %v381_v28 = vsel %vm267_vm6, %v380_v61, %v379_v23  ;;  %s1458_s24 = sshll.u32 %s1302_s30, 3 }
  0x3b   : > { %v609_v25 = vld [vmem:[%s1800_s9 + $0x35] sm:$0x1]  ;;  %v610_v26 = vld [vmem:[%s1800_s9 + $0x45] sm:$0x1]  ;;  %v459_v29 = vsel %vm255_vm2, %v458_v12, %v457_v24  ;;  %v622_v33 = vrot.slane %v607_v21, 7  ;;  %v624_v34 = vrot.slane %v608_v22, 6  ;;  %404 = vmatpush.msrb.mxu2 %v381_v28  ;;  %s1304_s22 = scalar_lea.hbm %s2275_s3, %s1458_s24 }
  0x3c   : > { %v611_v27 = vld [vmem:[%s1800_s9 + $0x55] sm:$0x1]  ;;  %v612_v30 = vld [vmem:[%s1800_s9 + $0x65] sm:$0x1]  ;;  %v461_v35 = vsel %vm258_vm3, %v460_v13, %v459_v29  ;;  %v626_v36 = vrot.slane %v609_v25, 5  ;;  %v628_v37 = vrot.slane %v610_v26, 4 }
  0x3d   : > { %v613_v31 = vld [vmem:[%s1800_s9 + $0x75] sm:$0x1]  ;;  %v630_v38 = vrot.slane %v611_v27, 3  ;;  %v1900_v39 = vld [vmem:[%s2273_s1 + $0x20] sm:$0xff]  ;;  %v463_v41 = vsel %vm261_vm4, %v462_v14, %v461_v35  ;;  %1418 = vmatmul.msk.f32.vlgmr.msrb.gmra.mxu2 %vm270_vm7, %v1878_v15  ;;  %v623_v42 = vsel %vm249_vm0, %v622_v33, %v606_v16  ;;  %v632_v43 = vrot.slane %v612_v30, 2  ;;  %v1961_v30 = vld [vmem:[%s2273_s1 + $0x18] sm:$0xff] }
  0x3e   : > { %v1905_v40 = vld [vmem:[%s2273_s1 + $0x10] sm:$0xff]  ;;  %v634_v44 = vrot.slane %v613_v31, 1  ;;  %1416 = vmatmul.msk.f32.vlgmr.msra.gmra.mxu1 %vm270_vm7, %v1900_v39  ;;  %v430_v45 = vld [vmem:[%s1800_s9 + $0x2] sm:$0x1]  ;;  %v465_v47 = vsel %vm264_vm5, %v464_v19, %v463_v41  ;;  %v625_v48 = vsel %vm252_vm1, %v624_v34, %v623_v42  ;;  %v662_v63 = vld [vmem:[%s1800_s9 + $0x6] sm:$0x1] }
  0x3f   : > { %v431_v46 = vld [vmem:[%s1800_s9 + $0x12] sm:$0x1]  ;;  %v432_v49 = vld [vmem:[%s1800_s9 + $0x22] sm:$0x1]  ;;  %v467_v53 = vsel %vm267_vm6, %v466_v20, %v465_v47  ;;  %v627_v54 = vsel %vm255_vm2, %v626_v36, %v625_v48  ;;  %v663_v4 = vld [vmem:[%s1800_s9 + $0x16] sm:$0x1] }
  0x40   : > { %v433_v50 = vld [vmem:[%s1800_s9 + $0x32] sm:$0x1]  ;;  %v434_v51 = vld [vmem:[%s1800_s9 + $0x42] sm:$0x1]  ;;  %490 = vmatpush.msrb.mxu3 %v467_v53  ;;  %v629_v59 = vsel %vm258_vm3, %v628_v37, %v627_v54  ;;  %v506_v60 = vrot.slane %v431_v46, 7  ;;  %v508_v61 = vrot.slane %v432_v49, 6 }
  0x41   : > { %v435_v55 = vld [vmem:[%s1800_s9 + $0x52] sm:$0x1]  ;;  %v436_v56 = vld [vmem:[%s1800_s9 + $0x62] sm:$0x1]  ;;  %v510_v62 = vrot.slane %v433_v50, 5  ;;  %v631_v0 = vsel %vm261_vm4, %v630_v38, %v629_v59  ;;  %1420 = vmatmul.msk.f32.vlgmr.msrb.gmra.mxu3 %vm270_vm7, %v1905_v40  ;;  %v512_v1 = vrot.slane %v434_v51, 4 }
  0x42   : > { %v437_v58 = vld [vmem:[%s1800_s9 + $0x72] sm:$0x1]  ;;  %v514_v2 = vrot.slane %v435_v55, 3  ;;  %v516_v3 = vrot.slane %v436_v56, 2  ;;  %v633_v6 = vsel %vm264_vm5, %v632_v43, %v631_v0  ;;  %v507_v7 = vsel %vm249_vm0, %v506_v60, %v430_v45  ;;  %v664_v9 = vld [vmem:[%s1800_s9 + $0x26] sm:$0x1] }
  0x43   : > { %v518_v8 = vrot.slane %v437_v58, 1  ;;  %v665_v10 = vld [vmem:[%s1800_s9 + $0x36] sm:$0x1]  ;;  %v678_v11 = vrot.slane %v663_v4, 7  ;;  %v635_v12 = vsel %vm267_vm6, %v634_v44, %v633_v6  ;;  %v509_v13 = vsel %vm252_vm1, %v508_v61, %v507_v7  ;;  %v666_v14 = vld [vmem:[%s1800_s9 + $0x46] sm:$0x1] }
  0x44   : > { %v667_v16 = vld [vmem:[%s1800_s9 + $0x56] sm:$0x1]  ;;  %v668_v17 = vld [vmem:[%s1800_s9 + $0x66] sm:$0x1]  ;;  %652 = vmatpush.msra.mxu2 %v635_v12  ;;  %v511_v18 = vsel %vm255_vm2, %v510_v62, %v509_v13  ;;  %v680_v21 = vrot.slane %v664_v9, 6  ;;  %v682_v22 = vrot.slane %v665_v10, 5 }
  0x45   : > { %v669_v19 = vld [vmem:[%s1800_s9 + $0x76] sm:$0x1]  ;;  %v679_v20 = vsel %vm249_vm0, %v678_v11, %v662_v63  ;;  %v550_v23 = vld [vmem:[%s1800_s9 + $0x4] sm:$0x1]  ;;  %v513_v24 = vsel %vm258_vm3, %v512_v1, %v511_v18  ;;  %v684_v25 = vrot.slane %v666_v14, 4  ;;  %v686_v26 = vrot.slane %v667_v16, 3  ;;  %1419 = vmatmul.msk.f32.gmra.mxu2 %vm270_vm7, %v1934_v5 }
  0x46   : > { %v688_v27 = vrot.slane %v668_v17, 2  ;;  %v551_v28 = vld [vmem:[%s1800_s9 + $0x14] sm:$0x1]  ;;  %v1956_v29 = vld [vmem:[%s2273_s1] sm:$0xff]  ;;  %v515_v31 = vsel %vm261_vm4, %v514_v2, %v513_v24  ;;  %v681_v33 = vsel %vm252_vm1, %v680_v21, %v679_v20  ;;  %v690_v34 = vrot.slane %v669_v19, 1  ;;  %v1999_v17 = vld [vmem:[%s2273_s1 + $0x8] sm:$0xff] }
  0x47   : > { %v552_v35 = vld [vmem:[%s1800_s9 + $0x24] sm:$0x1]  ;;  %v553_v36 = vld [vmem:[%s1800_s9 + $0x34] sm:$0x1]  ;;  %v566_v37 = vrot.slane %v551_v28, 7  ;;  %v517_v38 = vsel %vm264_vm5, %v516_v3, %v515_v31  ;;  %v683_v41 = vsel %vm255_vm2, %v682_v22, %v681_v33  ;;  %v1682_v31 = vmov 0  }
  0x48   : > { %v554_v42 = vld [vmem:[%s1800_s9 + $0x44] sm:$0x1]  ;;  %v555_v43 = vld [vmem:[%s1800_s9 + $0x54] sm:$0x1]  ;;  %v519_v45 = vsel %vm267_vm6, %v518_v8, %v517_v38  ;;  %v685_v46 = vsel %vm258_vm3, %v684_v25, %v683_v41  ;;  %v568_v49 = vrot.slane %v552_v35, 6  ;;  %v570_v51 = vrot.slane %v553_v36, 5  ;;  %1548 = vset.pattern.permute.xlu0 %v1682_v31 }
  0x49   : > { %v556_v44 = vld [vmem:[%s1800_s9 + $0x64] sm:$0x1]  ;;  %v557_v47 = vld [vmem:[%s1800_s9 + $0x74] sm:$0x1]  ;;  %v567_v48 = vsel %vm249_vm0, %v566_v37, %v550_v23  ;;  %542 = vmatpush.msrb.mxu0 %v519_v45  ;;  %v687_v50 = vsel %vm261_vm4, %v686_v26, %v685_v46  ;;  %v572_v53 = vrot.slane %v554_v42, 4  ;;  %v574_v54 = vrot.slane %v555_v43, 3  ;;  %1421 = vmatmul.msk.f32.gmra.mxu3 %vm270_vm7, %v1961_v30 }
  0x4a   : > { %v733_v55 = vld [vmem:[%s1800_s9 + $0x7] sm:$0x1]  ;;  %v734_v56 = vld [vmem:[%s1800_s9 + $0x17] sm:$0x1]  ;;  %v689_v58 = vsel %vm264_vm5, %v688_v27, %v687_v50  ;;  %v569_v59 = vsel %vm252_vm1, %v568_v49, %v567_v48  ;;  %v576_v60 = vrot.slane %v556_v44, 2  ;;  %v578_v61 = vrot.slane %v557_v47, 1  ;;  %1422 = vmatmul.msk.f32.vlgmr.msrb.gmra.mxu0 %vm270_vm7, %v1956_v29 }
  0x4b   : > { %v735_v62 = vld [vmem:[%s1800_s9 + $0x27] sm:$0x1]  ;;  %v736_v63 = vld [vmem:[%s1800_s9 + $0x37] sm:$0x1]  ;;  %v691_v0 = vsel %vm267_vm6, %v690_v34, %v689_v58  ;;  %v571_v1 = vsel %vm255_vm2, %v570_v51, %v569_v59  ;;  %v749_v8 = vrot.slane %v734_v56, 7  ;;  %s1307_s15 = sshll.u32 %s1304_s22, 4  ;;  %s1308_s15 = int_to_ptr.hbm [resolvable:$true] %s1307_s15 }
  0x4c   : > { %v737_v2 = vld [vmem:[%s1800_s9 + $0x47] sm:$0x1]  ;;  %v738_v3 = vld [vmem:[%s1800_s9 + $0x57] sm:$0x1]  ;;  %708 = vmatpush.msra.mxu3 %v691_v0  ;;  %v573_v6 = vsel %vm258_vm3, %v572_v53, %v571_v1  ;;  %v751_v9 = vrot.slane %v735_v62, 6  ;;  %v753_v10 = vrot.slane %v736_v63, 5 }
  0x4d   : > { %v739_v4 = vld [vmem:[%s1800_s9 + $0x67] sm:$0x1]  ;;  %v740_v7 = vld [vmem:[%s1800_s9 + $0x77] sm:$0x1]  ;;  %v575_v11 = vsel %vm261_vm4, %v574_v54, %v573_v6  ;;  %v755_v12 = vrot.slane %v737_v2, 4  ;;  %v757_v13 = vrot.slane %v738_v3, 3  ;;  %1426 = vmatmul.msk.f32.vlgmr.msra.gmra.mxu2 %vm270_vm7, %v1855_v57  ;;  %v750_v20 = vsel %vm249_vm0, %v749_v8, %v733_v55 }
  0x4e   : > { %v759_v14 = vrot.slane %v739_v4, 2  ;;  %v725_v16 = vld [vmem:[%s1800_s9 + $0x6] sm:$0x1]  ;;  %v577_v19 = vsel %vm264_vm5, %v576_v60, %v575_v11  ;;  %v761_v21 = vrot.slane %v740_v7, 1  ;;  %v726_v22 = vld [vmem:[%s1800_s9 + $0x16] sm:$0x1]  ;;  %v752_v25 = vsel %vm252_vm1, %v751_v9, %v750_v20 }
  0x4f   : > { %v208_v18 = vld [vmem:[%s2274_s2] sm:$0xff]  ;;  %v579_v24 = vsel %vm267_vm6, %v578_v61, %v577_v19  ;;  %v728_v26 = vld [vmem:[%s1800_s9 + $0x36] sm:$0x1]  ;;  %v754_v33 = vsel %vm255_vm2, %v753_v10, %v752_v25  ;;  %v795_v36 = vrot.slane %v726_v22, 7  ;;  %v833_v44 = vld [vmem:[%s1800_s9 + $0x8] sm:$0x1] }
  0x50   : > { %v727_v23 = vld [vmem:[%s1800_s9 + $0x26] sm:$0x1]  ;;  %v730_v28 = vld [vmem:[%s1800_s9 + $0x56] sm:$0x1]  ;;  %596 = vmatpush.msrb.mxu1 %v579_v24  ;;  %416 = vperm.xlu0 %1548, %v208_v18   ;;  %v756_v38 = vsel %vm258_vm3, %v755_v12, %v754_v33  ;;  %v799_v41 = vrot.slane %v728_v26, 5  ;;  %v209_v6 = vld [vmem:[%s2274_s2 + $0x8] sm:$0xff] }
  0x51   : > { %v729_v27 = vld [vmem:[%s1800_s9 + $0x46] sm:$0x1]  ;;  %v732_v35 = vld [vmem:[%s1800_s9 + $0x76] sm:$0x1]  ;;  %v797_v37 = vrot.slane %v727_v23, 6  ;;  %1424 = vmatmul.msk.f32.vlgmr.msrb.gmra.mxu1 %vm270_vm7, %v1900_v39  ;;  %v803_v43 = vrot.slane %v730_v28, 3  ;;  %1428 = vmatmul.msk.f32.vlgmr.msra.gmra.mxu3 %vm270_vm7, %v1878_v15  ;;  %v758_v45 = vsel %vm261_vm4, %v757_v13, %v756_v38  ;;  %v796_v46 = vsel %vm249_vm0, %v795_v36, %v725_v16 }
  0x52   : > { %v731_v34 = vld [vmem:[%s1800_s9 + $0x66] sm:$0x1]  ;;  %v801_v42 = vrot.slane %v729_v27, 4  ;;  %v807_v48 = vrot.slane %v732_v35, 1  ;;  %1423 = vmatmul.msk.f32.gmra.mxu0 %vm270_vm7, %v1999_v17  ;;  %v834_v49 = vld [vmem:[%s1800_s9 + $0x18] sm:$0x1]  ;;  %v760_v51 = vsel %vm264_vm5, %v759_v14, %v758_v45 }
  0x53   : > { %v805_v47 = vrot.slane %v731_v34, 2  ;;  %v835_v50 = vld [vmem:[%s1800_s9 + $0x28] sm:$0x1]  ;;  %v798_v53 = vsel %vm252_vm1, %v797_v37, %v796_v46  ;;  %v836_v54 = vld [vmem:[%s1800_s9 + $0x38] sm:$0x1]  ;;  %v762_v58 = vsel %vm267_vm6, %v761_v21, %v760_v51  ;;  %v849_v62 = vrot.slane %v834_v49, 7 }
  0x54   : > { %v837_v55 = vld [vmem:[%s1800_s9 + $0x48] sm:$0x1]  ;;  %v838_v56 = vld [vmem:[%s1800_s9 + $0x58] sm:$0x1]  ;;  %v800_v59 = vsel %vm255_vm2, %v799_v41, %v798_v53  ;;  %v851_v63 = vrot.slane %v835_v50, 6  ;;  %779 = vmatpush.msra.mxu0 %v762_v58  ;;  %v853_v1 = vrot.slane %v836_v54, 5 }
  0x55   : > { %v839_v60 = vld [vmem:[%s1800_s9 + $0x68] sm:$0x1]  ;;  %v840_v61 = vld [vmem:[%s1800_s9 + $0x78] sm:$0x1]  ;;  %v802_v0 = vsel %vm258_vm3, %v801_v42, %v800_v59  ;;  %v855_v2 = vrot.slane %v837_v55, 4  ;;  %v857_v3 = vrot.slane %v838_v56, 3  ;;  %1427 = vmatmul.msk.f32.gmra.mxu2 %vm270_vm7, %v1829_v32  ;;  %v850_v8 = vsel %vm249_vm0, %v849_v62, %v833_v44 }
  0x56   : > { %v889_v4 = vld [vmem:[%s1800_s9 + $0x9] sm:$0x1]  ;;  %v804_v7 = vsel %vm261_vm4, %v803_v43, %v802_v0  ;;  %v859_v9 = vrot.slane %v839_v60, 2  ;;  %v861_v10 = vrot.slane %v840_v61, 1  ;;  %v890_v11 = vld [vmem:[%s1800_s9 + $0x19] sm:$0x1]  ;;  %v852_v14 = vsel %vm252_vm1, %v851_v63, %v850_v8 }
  0x57   : > { %v891_v12 = vld [vmem:[%s1800_s9 + $0x29] sm:$0x1]  ;;  %v806_v13 = vsel %vm264_vm5, %v805_v47, %v804_v7  ;;  %v892_v16 = vld [vmem:[%s1800_s9 + $0x39] sm:$0x1]  ;;  %v854_v21 = vsel %vm255_vm2, %v853_v1, %v852_v14  ;;  %v905_v24 = vrot.slane %v890_v11, 7  ;;  %s1292_s23 = scalar_lea.sflag [#allocation4], %s1796_s7 }
  0x58   : > { %v893_v18 = vld [vmem:[%s1800_s9 + $0x49] sm:$0x1]  ;;  %v894_v19 = vld [vmem:[%s1800_s9 + $0x59] sm:$0x1]  ;;  %v808_v20 = vsel %vm267_vm6, %v807_v48, %v806_v13  ;;  %v907_v25 = vrot.slane %v891_v12, 6  ;;  %421 = vperm.xlu0 %1548, %v209_v6   ;;  %v856_v26 = vsel %vm258_vm3, %v855_v2, %v854_v21  ;;  %v909_v27 = vrot.slane %v892_v16, 5 }
  0x59   : > { %v895_v22 = vld [vmem:[%s1800_s9 + $0x69] sm:$0x1]  ;;  %v896_v23 = vld [vmem:[%s1800_s9 + $0x79] sm:$0x1]  ;;  %825 = vmatpush.msra.mxu1 %v808_v20  ;;  %v911_v28 = vrot.slane %v893_v18, 4  ;;  %v913_v31 = vrot.slane %v894_v19, 3  ;;  %1429 = vmatmul.msk.f32.gmra.mxu3 %vm270_vm7, %v1934_v5  ;;  %v858_v34 = vsel %vm261_vm4, %v857_v3, %v856_v26  ;;  %v906_v35 = vsel %vm249_vm0, %v905_v24, %v889_v4 }
  0x5a   : > { %v945_v33 = vld [vmem:[%s1800_s9 + $0xa] sm:$0x1]  ;;  %1425 = vmatmul.msk.f32.gmra.mxu1 %vm270_vm7, %v1849_v52  ;;  %v915_v36 = vrot.slane %v895_v22, 2  ;;  %v917_v37 = vrot.slane %v896_v23, 1  ;;  %1432 = vmatmul.msk.f32.vlgmr.msra.gmra.mxu0 %vm270_vm7, %v1905_v40  ;;  %v946_v38 = vld [vmem:[%s1800_s9 + $0x1a] sm:$0x1]  ;;  %v860_v42 = vsel %vm264_vm5, %v859_v9, %v858_v34  ;;  %v908_v43 = vsel %vm252_vm1, %v907_v25, %v906_v35 }
  0x5b   : > { %v947_v41 = vld [vmem:[%s1800_s9 + $0x2a] sm:$0x1]  ;;  %v948_v44 = vld [vmem:[%s1800_s9 + $0x3a] sm:$0x1]  ;;  %v862_v47 = vsel %vm267_vm6, %v861_v10, %v860_v42  ;;  %v910_v48 = vsel %vm255_vm2, %v909_v27, %v908_v43  ;;  %v961_v51 = vrot.slane %v946_v38, 7  ;;  %s1593_s27 = sshra.s32 %s1308_s15, 4  ;;  %s1594_s27 = int_to_ptr.hbm [resolvable:$true] %s1593_s27 }
  0x5c   : > { %v949_v45 = vld [vmem:[%s1800_s9 + $0x4a] sm:$0x1]  ;;  %v950_v46 = vld [vmem:[%s1800_s9 + $0x5a] sm:$0x1]  ;;  %v963_v53 = vrot.slane %v947_v41, 6  ;;  %879 = vmatpush.msrb.mxu2 %v862_v47  ;;  %v912_v54 = vsel %vm258_vm3, %v911_v28, %v910_v48  ;;  %v965_v55 = vrot.slane %v948_v44, 5  ;;  %p1600_p7 = scmp.lt.s32.totalorder %s1594_s27, %s2275_s3 }
  0x5d   : > { %v951_v49 = vld [vmem:[%s1800_s9 + $0x6a] sm:$0x1]  ;;  %v952_v50 = vld [vmem:[%s1800_s9 + $0x7a] sm:$0x1]  ;;  %v967_v56 = vrot.slane %v949_v45, 4  ;;  %v969_v58 = vrot.slane %v950_v46, 3  ;;  %v914_v60 = vsel %vm261_vm4, %v913_v31, %v912_v54  ;;  %v962_v61 = vsel %vm249_vm0, %v961_v51, %v945_v33  ;;  %1436 = vmatmul.msk.f32.vlgmr.msrb.gmra.mxu2 %vm270_vm7, %v1900_v39 }
  0x5e   : > { %v1016_v59 = vld [vmem:[%s1800_s9 + $0xb] sm:$0x1]  ;;  %v971_v62 = vrot.slane %v951_v49, 2  ;;  %v973_v63 = vrot.slane %v952_v50, 1  ;;  %v1017_v0 = vld [vmem:[%s1800_s9 + $0x1b] sm:$0x1]  ;;  %v916_v2 = vsel %vm264_vm5, %v915_v36, %v914_v60  ;;  %v964_v3 = vsel %vm252_vm1, %v963_v53, %v962_v61 }
  0x5f   : > { %v1018_v1 = vld [vmem:[%s1800_s9 + $0x2b] sm:$0x1]  ;;  %v1019_v4 = vld [vmem:[%s1800_s9 + $0x3b] sm:$0x1]  ;;  %v918_v8 = vsel %vm267_vm6, %v917_v37, %v916_v2  ;;  %v966_v9 = vsel %vm255_vm2, %v965_v55, %v964_v3  ;;  %v1032_v12 = vrot.slane %v1017_v0, 7  ;;  %s1595_s5 = scalar_lea.hbm %s1594_s27, 64 }
  0x60   : > { %v1020_v6 = vld [vmem:[%s1800_s9 + $0x4b] sm:$0x1]  ;;  %v1021_v7 = vld [vmem:[%s1800_s9 + $0x5b] sm:$0x1]  ;;  %v1034_v13 = vrot.slane %v1018_v1, 6  ;;  %935 = vmatpush.msrb.mxu3 %v918_v8  ;;  %v968_v14 = vsel %vm258_vm3, %v967_v56, %v966_v9  ;;  %v1036_v16 = vrot.slane %v1019_v4, 5  ;;  %p1596_p3 = scmp.ne.s32.totalorder %s1594_s27, %s1595_s5 }
  0x61   : > { %v1022_v10 = vld [vmem:[%s1800_s9 + $0x6b] sm:$0x1]  ;;  %v1023_v11 = vld [vmem:[%s1800_s9 + $0x7b] sm:$0x1]  ;;  %v1038_v18 = vrot.slane %v1020_v6, 4  ;;  %v1040_v19 = vrot.slane %v1021_v7, 3  ;;  %v970_v21 = vsel %vm261_vm4, %v969_v58, %v968_v14  ;;  %v1033_v22 = vsel %vm249_vm0, %v1032_v12, %v1016_v59  ;;  %1438 = vmatmul.msk.f32.vlgmr.msrb.gmra.mxu3 %vm270_vm7, %v1855_v57 }
  0x62   : > { %v1008_v20 = vld [vmem:[%s1800_s9 + $0xa] sm:$0x1]  ;;  %1434 = vmatmul.msk.f32.vlgmr.msra.gmra.mxu1 %vm270_vm7, %v1956_v29  ;;  %v1042_v23 = vrot.slane %v1022_v10, 2  ;;  %v1044_v24 = vrot.slane %v1023_v11, 1  ;;  %v1009_v25 = vld [vmem:[%s1800_s9 + $0x1a] sm:$0x1]  ;;  %1433 = vmatmul.msk.f32.gmra.mxu0 %vm270_vm7, %v1961_v30  ;;  %v972_v27 = vsel %vm264_vm5, %v971_v62, %v970_v21  ;;  %v1035_v28 = vsel %vm252_vm1, %v1034_v13, %v1033_v22  ;;  %p1597_p5 = pnand %p1596_p3, %p1771_p9 }
  0x63   : > { %v1010_v26 = vld [vmem:[%s1800_s9 + $0x2a] sm:$0x1]  ;;  %v1011_v31 = vld [vmem:[%s1800_s9 + $0x3a] sm:$0x1]  ;;  %v974_v35 = vsel %vm267_vm6, %v973_v63, %v972_v27  ;;  %v1037_v36 = vsel %vm255_vm2, %v1036_v16, %v1035_v28  ;;  %v1078_v41 = vrot.slane %v1009_v25, 7  ;;  %s1599_s11 = scalar_lea.hbm %s2275_s3, 256 }
  0x64   : > { %v1012_v33 = vld [vmem:[%s1800_s9 + $0x4a] sm:$0x1]  ;;  %v1013_v34 = vld [vmem:[%s1800_s9 + $0x5a] sm:$0x1]  ;;  %v1080_v42 = vrot.slane %v1010_v26, 6  ;;  %991 = vmatpush.msrb.mxu0 %v974_v35  ;;  %v1039_v43 = vsel %vm258_vm3, %v1038_v18, %v1037_v36  ;;  %v1082_v44 = vrot.slane %v1011_v31, 5  ;;  %p1598_p6 = pneg %p1597_p5  ;;  %p1601_p8 = scmp.lt.s32.totalorder %s1599_s11, %s1595_s5 }
  0x65   : > { %v1014_v37 = vld [vmem:[%s1800_s9 + $0x6a] sm:$0x1]  ;;  %v1015_v38 = vld [vmem:[%s1800_s9 + $0x7a] sm:$0x1]  ;;  %v1084_v45 = vrot.slane %v1012_v33, 4  ;;  %v1086_v46 = vrot.slane %v1013_v34, 3  ;;  %v1041_v48 = vsel %vm261_vm4, %v1040_v19, %v1039_v43  ;;  %v1079_v49 = vsel %vm249_vm0, %v1078_v41, %v1008_v20  ;;  %1437 = vmatmul.msk.f32.gmra.mxu2 %vm270_vm7, %v1849_v52 }
  0x66   : > { %v1116_v47 = vld [vmem:[%s1800_s9 + $0xc] sm:$0x1]  ;;  %v1088_v50 = vrot.slane %v1014_v37, 2  ;;  %v1090_v51 = vrot.slane %v1015_v38, 1  ;;  %v1117_v53 = vld [vmem:[%s1800_s9 + $0x1c] sm:$0x1]  ;;  %v1043_v55 = vsel %vm264_vm5, %v1042_v23, %v1041_v48  ;;  %v1081_v56 = vsel %vm252_vm1, %v1080_v42, %v1079_v49  ;;  %p1602_p10 = por %p1601_p8, %p1600_p7 }
  0x67   : > { %v1118_v54 = vld [vmem:[%s1800_s9 + $0x2c] sm:$0x1]  ;;  %v1119_v58 = vld [vmem:[%s1800_s9 + $0x3c] sm:$0x1]  ;;  %v1045_v61 = vsel %vm267_vm6, %v1044_v24, %v1043_v55  ;;  %v1083_v62 = vsel %vm255_vm2, %v1082_v44, %v1081_v56  ;;  %v1132_v1 = vrot.slane %v1117_v53, 7 }
  0x68   : > { %v1120_v59 = vld [vmem:[%s1800_s9 + $0x4c] sm:$0x1]  ;;  %v1121_v60 = vld [vmem:[%s1800_s9 + $0x5c] sm:$0x1]  ;;  %v1134_v2 = vrot.slane %v1118_v54, 6  ;;  %1062 = vmatpush.msrb.mxu1 %v1045_v61  ;;  %v1085_v3 = vsel %vm258_vm3, %v1084_v45, %v1083_v62  ;;  %v1136_v4 = vrot.slane %v1119_v58, 5  ;;  %p1603_p11 = pnand %p1602_p10, %p1598_p6 }
  0x69   : > { %v1122_v63 = vld [vmem:[%s1800_s9 + $0x6c] sm:$0x1]  ;;  %v1123_v0 = vld [vmem:[%s1800_s9 + $0x7c] sm:$0x1]  ;;  %v1138_v6 = vrot.slane %v1120_v59, 4  ;;  %v1140_v7 = vrot.slane %v1121_v60, 3  ;;  %v1087_v9 = vsel %vm261_vm4, %v1086_v46, %v1085_v3  ;;  %v1133_v10 = vsel %vm249_vm0, %v1132_v1, %v1116_v47  ;;  %1439 = vmatmul.msk.f32.gmra.mxu3 %vm270_vm7, %v1829_v32 }
  0x6a   : > { %v1172_v8 = vld [vmem:[%s1800_s9 + $0xd] sm:$0x1]  ;;  %1435 = vmatmul.msk.f32.gmra.mxu1 %vm270_vm7, %v1999_v17  ;;  %v1142_v11 = vrot.slane %v1122_v63, 2  ;;  %v1144_v12 = vrot.slane %v1123_v0, 1  ;;  %1440 = vmatmul.msk.f32.vlgmr.msrb.gmra.mxu0 %vm270_vm7, %v1878_v15  ;;  %v1173_v13 = vld [vmem:[%s1800_s9 + $0x1d] sm:$0x1]  ;;  %v1089_v16 = vsel %vm264_vm5, %v1088_v50, %v1087_v9  ;;  %v1135_v18 = vsel %vm252_vm1, %v1134_v2, %v1133_v10 }
  0x6b   : > { %v1174_v14 = vld [vmem:[%s1800_s9 + $0x2d] sm:$0x1]  ;;  %v1175_v19 = vld [vmem:[%s1800_s9 + $0x3d] sm:$0x1]  ;;  %v1091_v22 = vsel %vm267_vm6, %v1090_v51, %v1089_v16  ;;  %v1137_v23 = vsel %vm255_vm2, %v1136_v4, %v1135_v18  ;;  %v1188_v26 = vrot.slane %v1173_v13, 7 }
  0x6c   : > { %v1176_v20 = vld [vmem:[%s1800_s9 + $0x4d] sm:$0x1]  ;;  %v1177_v21 = vld [vmem:[%s1800_s9 + $0x5d] sm:$0x1]  ;;  %v1190_v27 = vrot.slane %v1174_v14, 6  ;;  %1108 = vmatpush.msra.mxu2 %v1091_v22  ;;  %v1139_v28 = vsel %vm258_vm3, %v1138_v6, %v1137_v23  ;;  %v1192_v31 = vrot.slane %v1175_v19, 5 }
  0x6d   : > { %v1178_v24 = vld [vmem:[%s1800_s9 + $0x6d] sm:$0x1]  ;;  %v1179_v25 = vld [vmem:[%s1800_s9 + $0x7d] sm:$0x1]  ;;  %v1194_v33 = vrot.slane %v1176_v20, 4  ;;  %v1196_v34 = vrot.slane %v1177_v21, 3  ;;  %v1141_v36 = vsel %vm261_vm4, %v1140_v7, %v1139_v28  ;;  %v1189_v37 = vsel %vm249_vm0, %v1188_v26, %v1172_v8  ;;  %1446 = vmatmul.msk.f32.vlgmr.msra.gmra.mxu2 %vm270_vm7, %v1956_v29 }
  0x6e   : > { %v1228_v35 = vld [vmem:[%s1800_s9 + $0xe] sm:$0x1]  ;;  %v1198_v38 = vrot.slane %v1178_v24, 2  ;;  %v1200_v41 = vrot.slane %v1179_v25, 1  ;;  %v1229_v42 = vld [vmem:[%s1800_s9 + $0x1e] sm:$0x1]  ;;  %v1143_v44 = vsel %vm264_vm5, %v1142_v11, %v1141_v36  ;;  %v1191_v45 = vsel %vm252_vm1, %v1190_v27, %v1189_v37 }
  0x6f   : > { %v1230_v43 = vld [vmem:[%s1800_s9 + $0x2e] sm:$0x1]  ;;  %v1231_v46 = vld [vmem:[%s1800_s9 + $0x3e] sm:$0x1]  ;;  %v1145_v49 = vsel %vm267_vm6, %v1144_v12, %v1143_v44  ;;  %v1193_v50 = vsel %vm255_vm2, %v1192_v31, %v1191_v45  ;;  %v1244_v53 = vrot.slane %v1229_v42, 7 }
  0x70   : > { %v1232_v47 = vld [vmem:[%s1800_s9 + $0x4e] sm:$0x1]  ;;  %v1233_v48 = vld [vmem:[%s1800_s9 + $0x5e] sm:$0x1]  ;;  %v1246_v54 = vrot.slane %v1230_v43, 6  ;;  %1162 = vmatpush.msra.mxu3 %v1145_v49  ;;  %v1195_v55 = vsel %vm258_vm3, %v1194_v33, %v1193_v50  ;;  %v1248_v58 = vrot.slane %v1231_v46, 5 }
  0x71   : > { %v1234_v51 = vld [vmem:[%s1800_s9 + $0x6e] sm:$0x1]  ;;  %v1235_v56 = vld [vmem:[%s1800_s9 + $0x7e] sm:$0x1]  ;;  %v1250_v29 = vrot.slane %v1232_v47, 4  ;;  %v1197_v59 = vsel %vm261_vm4, %v1196_v34, %v1195_v55  ;;  %v1245_v60 = vsel %vm249_vm0, %v1244_v53, %v1228_v35  ;;  %v1252_v61 = vrot.slane %v1233_v48, 3  ;;  %1448 = vmatmul.msk.f32.vlgmr.msra.gmra.mxu3 %vm270_vm7, %v1900_v39 }
  0x72   : > { %1444 = vmatmul.msk.f32.vlgmr.msrb.gmra.mxu1 %vm270_vm7, %v1905_v40  ;;  %1441 = vmatmul.msk.f32.gmra.mxu0 %vm270_vm7, %v1934_v5  ;;  %v1199_v62 = vsel %vm264_vm5, %v1198_v38, %v1197_v59  ;;  %v1247_v63 = vsel %vm252_vm1, %v1246_v54, %v1245_v60  ;;  %v1254_v0 = vrot.slane %v1234_v51, 2  ;;  %v1256_v3 = vrot.slane %v1235_v56, 1  ;;  %s1405_s9 = sshll.u32 %s1796_s7, 6 }
  0x73   : > { %v1201_v1 = vsel %vm267_vm6, %v1200_v41, %v1199_v62  ;;  %v1249_v2 = vsel %vm255_vm2, %v1248_v58, %v1247_v63  ;;  %s2208_s25 = scalar_lea.vmem [#allocation5], %s1405_s9 }
  0x74   : > { %1218 = vmatpush.msra.mxu0 %v1201_v1  ;;  %v1251_v40 = vsel %vm258_vm3, %v1250_v29, %v1249_v2  ;;  %s1305_s16 = sshll.u32 %s2208_s25, 4  ;;  %s1306_s16 = int_to_ptr.vmem [resolvable:$true] %s1305_s16 }
  0x75   : > { %v1253_v4 = vsel %vm261_vm4, %v1252_v61, %v1251_v40  ;;  %1447 = vmatmul.msk.f32.gmra.mxu2 %vm270_vm7, %v1999_v17 }
  0x76   : > { %v1255_v6 = vsel %vm264_vm5, %v1254_v0, %v1253_v4 }
  0x77   : > { %v1257_v7 = vsel %vm267_vm6, %v1256_v3, %v1255_v6 }
  0x78   : > { %1274 = vmatpush.msra.mxu1 %v1257_v7 }
  0x79   : > { %1449 = vmatmul.msk.f32.gmra.mxu3 %vm270_vm7, %v1849_v52 }
  0x7a   : > { %1445 = vmatmul.msk.f32.gmra.mxu1 %vm270_vm7, %v1961_v30  ;;  %1450 = vmatmul.msk.f32.vlgmr.msra.gmra.mxu0 %vm270_vm7, %v1855_v57 }
  0x82   : > { %1452 = vmatmul.msk.f32.vlgmr.msra.gmra.mxu1 %vm270_vm7, %v1878_v15  ;;  %1451 = vmatmul.msk.f32.gmra.mxu0 %vm270_vm7, %v1829_v32 }
  0x8a   : > { %1453 = vmatmul.msk.f32.gmra.mxu1 %vm270_vm7, %v1934_v5 }
  0xb3   : > { %v294_v9 = vpop.f32.mrf.mxu0 }
  0xb8   : > { %v297_v39 = vpop.f32.mrf.mxu2 }
  0xbb   : > { %v349_v17 = vpop.f32.mrf.mxu3  ;;  %v346_v8 = vpop.f32.mrf.mxu1 }
  0xbc   : > { %v347_v30 = vadd.f32 %v346_v8, %v294_v9  ;;  %v350_v13 = vadd.f32 %v349_v17, %v297_v39 }
  0xc0   : > { %v406_v10 = vpop.f32.mrf.mxu2 }
  0xc1   : > { %v412_v11 = vadd.f32 %v406_v10, %v347_v30 }
  0xc2   : > { %v2205_v57 = vpop.permute.xlu0 %416 }
  0xc3   : > { %v424_v52 = vadd.f32 %v2205_v57, %v412_v11 }
  0xc4   : > { %v492_v12 = vpop.f32.mrf.mxu3 }
  0xc5   : > { %v426_v15 = vmax.f32 %v424_v52, 0.0 }
  0xc7   : > { %v544_v14 = vpop.f32.mrf.mxu0  ;;  %428 = vst [vmem:[%s2208_s25] sm:$0xff] %v426_v15 }
  0xc8   : > { %v409_v32 = vpop.f32.mrf.mxu2  ;;  %v545_v18 = vadd.f32 %v544_v14, %v492_v12 }
  0xc9   : > { %v413_v5 = vadd.f32 %v409_v32, %v350_v13 }
  0xca   : > { %v2211_v16 = vpop.permute.xlu0 %421 }
  0xcb   : > { %v425_v19 = vadd.f32 %v2211_v16, %v413_v5 }
  0xcc   : > { %v495_v20 = vpop.f32.mrf.mxu3 }
  0xcd   : > { %v427_v21 = vmax.f32 %v425_v19, 0.0 }
  0xce   : > { %v598_v22 = vpop.f32.mrf.mxu1 }
  0xcf   : > { %v604_v23 = vadd.f32 %v598_v22, %v545_v18  ;;  %v547_v24 = vpop.f32.mrf.mxu0  ;;  %429 = vst [vmem:[%s2208_s25 + $0x8] sm:$0xff] %v427_v21 }
  0xd0   : > { %v654_v25 = vpop.f32.mrf.mxu2  ;;  %v548_v27 = vadd.f32 %v547_v24, %v495_v20 }
  0xd1   : > { %v660_v26 = vadd.f32 %v654_v25, %v604_v23 }
  0xd4   : > { %v710_v28 = vpop.f32.mrf.mxu3 }
  0xd5   : > { %v716_v31 = vadd.f32 %v710_v28, %v660_v26 }
  0xd7   : > { %v601_v33 = vpop.f32.mrf.mxu1  ;;  %v718_v34 = vadd.f32 %v716_v31, %v2205_v57  ;;  %v781_v35 = vpop.f32.mrf.mxu0 }
  0xd8   : > { %v605_v36 = vadd.f32 %v601_v33, %v548_v27  ;;  %v657_v37 = vpop.f32.mrf.mxu2 }
  0xd9   : > { %v720_v38 = vmax.f32 %v718_v34, 0.0 }
  0xda   : > { %v661_v41 = vadd.f32 %v657_v37, %v605_v36 }
  0xdb   : > { %1430 = vst [vmem:[%s2208_s25 + $0x10] sm:$0xff] %v720_v38 }
  0xdc   : > { %v713_v42 = vpop.f32.mrf.mxu3 }
  0xdd   : > { %v717_v43 = vadd.f32 %v713_v42, %v661_v41 }
  0xdf   : > { %v827_v44 = vpop.f32.mrf.mxu1  ;;  %v719_v45 = vadd.f32 %v717_v43, %v2211_v16  ;;  %v784_v46 = vpop.f32.mrf.mxu0 }
  0xe0   : > { %v828_v47 = vadd.f32 %v827_v44, %v781_v35  ;;  %v881_v49 = vpop.f32.mrf.mxu2 }
  0xe1   : > { %v721_v48 = vmax.f32 %v719_v45, 0.0 }
  0xe2   : > { %v887_v50 = vadd.f32 %v881_v49, %v828_v47 }
  0xe3   : > { %1431 = vst [vmem:[%s2208_s25 + $0x18] sm:$0xff] %v721_v48 }
  0xe4   : > { %v937_v51 = vpop.f32.mrf.mxu3 }
  0xe5   : > { %v943_v54 = vadd.f32 %v937_v51, %v887_v50 }
  0xe7   : > { %v830_v53 = vpop.f32.mrf.mxu1  ;;  %v993_v55 = vpop.f32.mrf.mxu0 }
  0xe8   : > { %v831_v56 = vadd.f32 %v830_v53, %v784_v46  ;;  %v999_v58 = vadd.f32 %v993_v55, %v943_v54  ;;  %v884_v29 = vpop.f32.mrf.mxu2 }
  0xea   : > { %v1001_v59 = vadd.f32 %v999_v58, %v2205_v57  ;;  %v888_v60 = vadd.f32 %v884_v29, %v831_v56 }
  0xec   : > { %v1003_v61 = vmax.f32 %v1001_v59, 0.0  ;;  %v940_v62 = vpop.f32.mrf.mxu3 }
  0xed   : > { %v944_v0 = vadd.f32 %v940_v62, %v888_v60 }
  0xee   : > { %1442 = vst [vmem:[%s2208_s25 + $0x20] sm:$0xff] %v1003_v61 }
  0xef   : > { %v1064_v63 = vpop.f32.mrf.mxu1  ;;  %v996_v1 = vpop.f32.mrf.mxu0 }
  0xf0   : > { %v1000_v2 = vadd.f32 %v996_v1, %v944_v0  ;;  %v1110_v3 = vpop.f32.mrf.mxu2 }
  0xf1   : > { %v1111_v4 = vadd.f32 %v1110_v3, %v1064_v63 }
  0xf2   : > { %v1002_v40 = vadd.f32 %v1000_v2, %v2211_v16 }
  0xf4   : > { %v1004_v6 = vmax.f32 %v1002_v40, 0.0  ;;  %v1164_v7 = vpop.f32.mrf.mxu3 }
  0xf5   : > { %v1170_v8 = vadd.f32 %v1164_v7, %v1111_v4 }
  0xf6   : > { %1443 = vst [vmem:[%s2208_s25 + $0x28] sm:$0xff] %v1004_v6 }
  0xf7   : > { %v1067_v39 = vpop.f32.mrf.mxu1  ;;  %v1220_v17 = vpop.f32.mrf.mxu0 }
  0xf8   : > { %v1113_v9 = vpop.f32.mrf.mxu2  ;;  %v1226_v30 = vadd.f32 %v1220_v17, %v1170_v8 }
  0xf9   : > { %v1114_v10 = vadd.f32 %v1113_v9, %v1067_v39 }
  0xfc   : > { %v1167_v11 = vpop.f32.mrf.mxu3 }
  0xfd   : > { %v1171_v15 = vadd.f32 %v1167_v11, %v1114_v10 }
  0xff   : > { %v1276_v52 = vpop.f32.mrf.mxu1  ;;  %v1223_v13 = vpop.f32.mrf.mxu0 }
 0x100   : > { %v1282_v12 = vadd.f32 %v1276_v52, %v1226_v30  ;;  %v1227_v5 = vadd.f32 %v1223_v13, %v1171_v15 }
 0x102   : > { %v1284_v14 = vadd.f32 %v1282_v12, %v2205_v57 }
 0x104   : > { %v1286_v32 = vmax.f32 %v1284_v14, 0.0 }
 0x106   : > { %1454 = vst [vmem:[%s2208_s25 + $0x30] sm:$0xff] %v1286_v32 }
 0x107   : > { %v1279_v18 = vpop.f32.mrf.mxu1 }
 0x108   : > { %v1283_v19 = vadd.f32 %v1279_v18, %v1227_v5 }
 0x10a   : > { %v1285_v20 = vadd.f32 %v1283_v19, %v2211_v16 }
 0x10c   : > { %v1287_v21 = vmax.f32 %v1285_v20, 0.0 }
 0x10e   : > { %1455 = vst [vmem:[%s2208_s25 + $0x38] sm:$0xff] %v1287_v21 }
 0x10f   : > { %1606 = shalt.err (!%p1603_p11)
}
 0x110   : > { %s1683_s7 = smov 128   ;;  %s1684_s9 = smov 256  }
 0x111   : > { %s1685_s25 = smov 8  }
 0x112   : > { %1465 = dma.vmem_to_hbm [thread:$0]  (%p1771_p9), %s1306_s16, 1024, %s1308_s15, %s1292_s23, %s1683_s7, %s1684_s9, %s1685_s25  }
 0x113 PF: > { %p1476_p13 = scmp.ge.s32.totalorder %s1677_s19, 2  ;;  %s1322_s29 = sand.u32 1, %s1649_s12  }
 0x114   : > { %s1323_s30 = scalar_lea.sflag [#allocation4], %s1322_s29 }
 0x115   : > { %p1472_p0 = pnand %p1476_p13, %p1777_p12 }
 0x117   : > { %p1473_p1 = pneg %p1472_p0 }
 0x119   : > { %1644 = dma.done.wait (%p1473_p1), %s1323_s30, 1024  }
 0x11a   : > { %1646 = vsyncadd (%p1473_p1), %s1323_s30, 4294966272  ;;  %s19_s19 = sadd.s32 1, %s1677_s19   ;;  %s2285_s24 = sld [smem:[#allocation10_spill]] }
 0x11b   : > { %p16_p2 = scmp.ge.s32.totalorder %s19_s19, 6   ;;  %s2286_s28 = sld [smem:[#allocation8_spill]] }
 0x11c   : > { %s2287_s8 = sld [smem:[#allocation9_spill]]  ;;  %s2288_s12 = smov %s1653_s13 }
 0x11d   : > { %s2289_s13 = smov %s1657_s14  ;;  %s2291_s15 = smov %s1669_s17 }
 0x11e   : > { %s2292_s16 = smov %s1673_s18  ;;  %18 = sbr.rel (!%p16_p2) target bundleno = 7 (0x7), region = 84 }
 0x120   : > { %s2290_s14 = smov %s2285_s24 }
 0x121   : > { %s2293_s17 = smov %s2286_s28 }
 0x122   : > { %s2294_s18 = smov %s2287_s8 }
 0x123   :  { %1329 = vsyncpa [#allocation3], 1 }
 0x124   :  { %1331 = vsyncpa [#allocation3 + $0x1], 1 }
 0x125   :  { %1332 = vsyncpa [#allocation4], 1 }
 0x126   :  { %1334 = vsyncpa [#allocation4 + $0x1], 1 }

</bundles_post_ra>
